<compile_context>
chip_gen: v7x
topology: tpu7x:2x2x1
jax: 0.10.0
libtpu: 0.0.40
codegen_flags: <defaults>
</compile_context>

<pallas_src>
import jax
import jax.numpy as jnp
from jax.experimental import pallas as pl
from jax.experimental.pallas import tpu as pltpu


def rnd_fused_kernel(xt_ref, w1t_ref, b1_ref, w2t_ref, b2_ref, wot_ref, bo_ref,
                     err_ref):
    """One tile of tile_n nodes (on lanes) through the fused (f - f_hat) chain."""
    xt = xt_ref[...]                                                   # (D, tile_n)
    ew_dtype = b1_ref.dtype                                            # bf16 (or f32)

    h = jnp.dot(w1t_ref[...], xt, preferred_element_type=jnp.float32)  # (2H, tile_n)
    h = jnp.maximum(h.astype(ew_dtype) + b1_ref[...], 0)               # bias+ReLU, bf16

    h = jnp.dot(w2t_ref[...], h, preferred_element_type=jnp.float32)   # (2H, tile_n)
    h = jnp.maximum(h.astype(ew_dtype) + b2_ref[...], 0)

    d = jnp.dot(wot_ref[...], h, preferred_element_type=jnp.float32)   # (O, tile_n)
    d = d + bo_ref[...]                                                 # f32
    # torch.norm(..., dim=1): L2 over the output-feature axis (sublanes here).
    err_ref[...] = jnp.sqrt(jnp.sum(d * d, axis=0, keepdims=True))     # (1, tile_n)


def fuse_rnd_params(f_params, g_params, mm_dtype=jnp.bfloat16):
    """Fuse + transpose the two random networks' weights.

    Call ONCE per parameter update (not per forward): the kernel then produces
    d = f(X) - f_hat(X) directly, with the node axis on lanes."""
    fw1, fb1, fw2, fb2, fwo, fbo = f_params
    gw1, gb1, gw2, gb2, gwo, gbo = g_params
    H = fw1.shape[1]
    z = jnp.zeros((H, H), jnp.float32)
    w1t = jnp.concatenate([fw1, gw1], axis=1).T.astype(mm_dtype)        # (2H, D)
    b1t = jnp.concatenate([fb1, gb1], axis=1).T.astype(mm_dtype)        # (2H, 1)
    w2t = jnp.block([[fw2, z], [z, gw2]]).T.astype(mm_dtype)            # (2H, 2H)
    b2t = jnp.concatenate([fb2, gb2], axis=1).T.astype(mm_dtype)        # (2H, 1)
    wot = jnp.concatenate([fwo, -gwo], axis=0).T.astype(mm_dtype)       # (O, 2H)
    bot = (fbo - gbo).T.astype(jnp.float32)                             # (O, 1)
    return w1t, b1t, w2t, b2t, wot, bot


def _plan_tiles(N):
    """Return (tile_n, padded_N). Node axis is on lanes, so tiles are multiples
    of 128; grid stays >= 2 for medium/large N (both v7x TCs get work); tile
    ceiling 4096 keeps the per-tile working set ~1 MiB while amortizing the
    per-grid-step overhead."""
    n_pad = ((N + 127) // 128) * 128
    if n_pad <= 128:
        return n_pad, n_pad
    tile = min(4096, ((n_pad // 2 + 127) // 128) * 128)
    n_pad = ((n_pad + tile - 1) // tile) * tile
    return tile, n_pad


def rnd_distillation_forward(x, fused_params, *, tile_n=None):
    """x: (N, D) float32 node/state features.  fused_params: output of
    fuse_rnd_params.  Returns errors of shape (N,) float32."""
    N, D = x.shape
    w1t, b1t, w2t, b2t, wot, bot = fused_params
    mm_dtype = w1t.dtype

    if tile_n is None:
        tile_n, n_pad = _plan_tiles(N)
    else:
        assert tile_n % 128 == 0 or tile_n == N
        n_pad = ((N + tile_n - 1) // tile_n) * tile_n

    # Node axis onto lanes: (D, n_pad), cast once for the MXU.  Pad columns
    # produce garbage norms that are sliced off below.
    xt = x.T.astype(mm_dtype)
    if n_pad != N:
        xt = jnp.pad(xt, ((0, 0), (0, n_pad - N)))

    params = (w1t, b1t, w2t, b2t, wot, bot)
    # Constant index_map => the tiny fused weights stay resident across grid
    # steps (no per-step re-DMA).
    param_specs = [pl.BlockSpec(p.shape, lambda i: (0, 0)) for p in params]

    err = pl.pallas_call(
        rnd_fused_kernel,
        out_shape=jax.ShapeDtypeStruct((1, n_pad), jnp.float32),
        grid=(n_pad // tile_n,),
        in_specs=[pl.BlockSpec((D, tile_n), lambda i: (0, i))] + param_specs,
        out_specs=pl.BlockSpec((1, tile_n), lambda i: (0, i)),
        compiler_params=pltpu.CompilerParams(
            dimension_semantics=("parallel",),
        ),
    )(xt, *params)
    return err[0, :N]


def make_network_params(key, input_dim, hidden, out_dim, init_method):
    """Mimics RandomNetwork param shapes (rnd_nb_layers=2).

    init_method 'uniform' -> U[0,1), 'normal' -> N(0,1) for the hidden layers
    (as in init_network); final layer uses the PyTorch-default-style uniform."""
    ks = jax.random.split(key, 6)

    def hidden_init(k, shape):
        if init_method == "uniform":
            return jax.random.uniform(k, shape, jnp.float32)
        return jax.random.normal(k, shape, jnp.float32)

    def default_init(k, shape, fan_in):
        bound = 1.0 / jnp.sqrt(float(fan_in))
        return jax.random.uniform(k, shape, jnp.float32, -bound, bound)

    w1 = hidden_init(ks[0], (input_dim, hidden))
    b1 = hidden_init(ks[1], (1, hidden))
    w2 = hidden_init(ks[2], (hidden, hidden))
    b2 = hidden_init(ks[3], (1, hidden))
    wo = default_init(ks[4], (hidden, out_dim), hidden)
    bo = default_init(ks[5], (1, out_dim), hidden)
    return (w1, b1, w2, b2, wo, bo)


def reference_forward(x, f_params, g_params):
    def mlp(p):
        w1, b1, w2, b2, wo, bo = p
        h = jnp.maximum(x @ w1 + b1, 0.0)
        h = jnp.maximum(h @ w2 + b2, 0.0)
        return h @ wo + bo
    d = mlp(f_params) - mlp(g_params)
    return jnp.sqrt(jnp.sum(d * d, axis=1))


if __name__ == "__main__":
    # Shapes consistent with the module: gnn_nb_layers=0 (identity embedding),
    # input_dim=32, rnd_nb_layers=2, rnd_nb_hidden=32, rnd_nb_output=16.
    D, H, O = 32, 32, 16

    key = jax.random.PRNGKey(0)
    k_x, k_x2, k_f, k_g = jax.random.split(key, 4)

    f_params = make_network_params(k_f, D, H, O, init_method="uniform")   # self.f
    g_params = make_network_params(k_g, D, H, O, init_method="normal")    # self.f_hat

    # Fuse once (hoisted out of the per-forward path).
    fused = fuse_rnd_params(f_params, g_params, mm_dtype=jnp.bfloat16)
    fwd = jax.jit(lambda xx: rnd_distillation_forward(xx, fused))

    # Case 1: N=128 nodes (single 128-lane tile).
    x = jax.random.normal(k_x, (128, D), jnp.float32)
    errors = jax.block_until_ready(fwd(x))
    ref = reference_forward(x, f_params, g_params)
    assert errors.shape == (128,)
    # bf16 MXU operands / bf16 bias+ReLU with f32 accumulation: compare against
    # the f32 reference with a correspondingly loosened tolerance.
    assert jnp.allclose(errors, ref, rtol=5e-2, atol=0.5), "mismatch (N=128)"

    # Case 2: N=200 nodes (non-multiple of 128 -> padded to 256, grid=2).
    x2 = jax.random.normal(k_x2, (200, D), jnp.float32)
    errors2 = jax.block_until_ready(fwd(x2))
    ref2 = reference_forward(x2, f_params, g_params)
    assert errors2.shape == (200,)
    assert jnp.allclose(errors2, ref2, rtol=5e-2, atol=0.5), "mismatch (N=200)"

    print("KERNEL_OK")
</pallas_src>

<mosaic_0001>
module attributes {stable_mosaic.version = 11 : i64} {
  func.func @rnd_fused_kernel(%arg0: i32, %arg1: memref<32x128xbf16, #tpu.memory_space<vmem>>, %arg2: memref<64x32xbf16, #tpu.memory_space<vmem>>, %arg3: memref<64x1xbf16, #tpu.memory_space<vmem>>, %arg4: memref<64x64xbf16, #tpu.memory_space<vmem>>, %arg5: memref<64x1xbf16, #tpu.memory_space<vmem>>, %arg6: memref<16x64xbf16, #tpu.memory_space<vmem>>, %arg7: memref<16x1xf32, #tpu.memory_space<vmem>>, %arg8: memref<1x128xf32, #tpu.memory_space<vmem>>) attributes {dimension_semantics = [#tpu.dimension_semantics<parallel>], iteration_bounds = array<i64: 1>, scalar_prefetch = 0 : i64, scratch_operands = 0 : i64, tpu.core_type = #tpu.core_type<tc>, window_params = [{transform_indices = @transform_0, window_bounds = array<i64: 32, 128>}, {pipeline_mode = #tpu.pipeline_mode<synchronous>, transform_indices = @transform_1, window_bounds = array<i64: 64, 32>}, {pipeline_mode = #tpu.pipeline_mode<synchronous>, transform_indices = @transform_2, window_bounds = array<i64: 64, 1>}, {pipeline_mode = #tpu.pipeline_mode<synchronous>, transform_indices = @transform_3, window_bounds = array<i64: 64, 64>}, {pipeline_mode = #tpu.pipeline_mode<synchronous>, transform_indices = @transform_4, window_bounds = array<i64: 64, 1>}, {pipeline_mode = #tpu.pipeline_mode<synchronous>, transform_indices = @transform_5, window_bounds = array<i64: 16, 64>}, {pipeline_mode = #tpu.pipeline_mode<synchronous>, transform_indices = @transform_6, window_bounds = array<i64: 16, 1>}, {transform_indices = @transform_7, window_bounds = array<i64: 1, 128>}]} {
    %c0 = arith.constant 0 : index
    %c0_0 = arith.constant 0 : index
    %0 = vector.load %arg1[%c0, %c0_0] : memref<32x128xbf16, #tpu.memory_space<vmem>>, vector<32x128xbf16>
    %c0_1 = arith.constant 0 : index
    %c0_2 = arith.constant 0 : index
    %1 = vector.load %arg2[%c0_1, %c0_2] : memref<64x32xbf16, #tpu.memory_space<vmem>>, vector<64x32xbf16>
    %cst = arith.constant dense<0.000000e+00> : vector<64x128xf32>
    %2 = tpu.matmul %1, %0, %cst {dimension_numbers = #tpu.dot_dimension_numbers<[1], [0], [0], [1], [0, 0, 1, 1], [], []>} : vector<64x32xbf16>, vector<32x128xbf16>, vector<64x128xf32> -> vector<64x128xf32>
    %3 = arith.truncf %2 : vector<64x128xf32> to vector<64x128xbf16>
    %c0_3 = arith.constant 0 : index
    %c0_4 = arith.constant 0 : index
    %4 = vector.load %arg3[%c0_3, %c0_4] : memref<64x1xbf16, #tpu.memory_space<vmem>>, vector<64x1xbf16>
    %5 = vector.broadcast %4 : vector<64x1xbf16> to vector<64x128xbf16>
    %6 = arith.addf %3, %5 : vector<64x128xbf16>
    %cst_5 = arith.constant 0.000000e+00 : bf16
    %7 = vector.broadcast %cst_5 : bf16 to vector<64x128xbf16>
    %8 = arith.maximumf %6, %7 : vector<64x128xbf16>
    %c0_6 = arith.constant 0 : index
    %c0_7 = arith.constant 0 : index
    %9 = vector.load %arg4[%c0_6, %c0_7] : memref<64x64xbf16, #tpu.memory_space<vmem>>, vector<64x64xbf16>
    %cst_8 = arith.constant dense<0.000000e+00> : vector<64x128xf32>
    %10 = tpu.matmul %9, %8, %cst_8 {dimension_numbers = #tpu.dot_dimension_numbers<[1], [0], [0], [1], [0, 0, 1, 1], [], []>} : vector<64x64xbf16>, vector<64x128xbf16>, vector<64x128xf32> -> vector<64x128xf32>
    %11 = arith.truncf %10 : vector<64x128xf32> to vector<64x128xbf16>
    %c0_9 = arith.constant 0 : index
    %c0_10 = arith.constant 0 : index
    %12 = vector.load %arg5[%c0_9, %c0_10] : memref<64x1xbf16, #tpu.memory_space<vmem>>, vector<64x1xbf16>
    %13 = vector.broadcast %12 : vector<64x1xbf16> to vector<64x128xbf16>
    %14 = arith.addf %11, %13 : vector<64x128xbf16>
    %cst_11 = arith.constant 0.000000e+00 : bf16
    %15 = vector.broadcast %cst_11 : bf16 to vector<64x128xbf16>
    %16 = arith.maximumf %14, %15 : vector<64x128xbf16>
    %c0_12 = arith.constant 0 : index
    %c0_13 = arith.constant 0 : index
    %17 = vector.load %arg6[%c0_12, %c0_13] : memref<16x64xbf16, #tpu.memory_space<vmem>>, vector<16x64xbf16>
    %cst_14 = arith.constant dense<0.000000e+00> : vector<16x128xf32>
    %18 = tpu.matmul %17, %16, %cst_14 {dimension_numbers = #tpu.dot_dimension_numbers<[1], [0], [0], [1], [0, 0, 1, 1], [], []>} : vector<16x64xbf16>, vector<64x128xbf16>, vector<16x128xf32> -> vector<16x128xf32>
    %c0_15 = arith.constant 0 : index
    %c0_16 = arith.constant 0 : index
    %19 = vector.load %arg7[%c0_15, %c0_16] : memref<16x1xf32, #tpu.memory_space<vmem>>, vector<16x1xf32>
    %20 = vector.broadcast %19 : vector<16x1xf32> to vector<16x128xf32>
    %21 = arith.addf %18, %20 : vector<16x128xf32>
    %22 = arith.mulf %21, %21 : vector<16x128xf32>
    %cst_17 = arith.constant dense<0.000000e+00> : vector<128xf32>
    %23 = vector.multi_reduction <add>, %22, %cst_17 [0] : vector<16x128xf32> to vector<128xf32>
    %24 = vector.shape_cast %23 : vector<128xf32> to vector<1x128xf32>
    %25 = math.sqrt %24 : vector<1x128xf32>
    %c0_18 = arith.constant 0 : index
    %c0_19 = arith.constant 0 : index
    %26 = vector.load %arg8[%c0_18, %c0_19] : memref<1x128xf32, #tpu.memory_space<vmem>>, vector<1x128xf32>
    tpu.vector_store %arg8[%c0_18, %c0_19], %25 {strides = array<i32>} : memref<1x128xf32, #tpu.memory_space<vmem>>, vector<1x128xf32>,
    return
  }
  func.func @transform_0(%arg0: i32) -> (i32, i32) {
    %c0_i32 = arith.constant 0 : i32
    %c0_i32_0 = arith.constant 0 : i32
    return %c0_i32, %arg0 : i32, i32
  }
  func.func @transform_1(%arg0: i32) -> (i32, i32) {
    %c0_i32 = arith.constant 0 : i32
    %c0_i32_0 = arith.constant 0 : i32
    %c0_i32_1 = arith.constant 0 : i32
    return %c0_i32, %c0_i32_0 : i32, i32
  }
  func.func @transform_2(%arg0: i32) -> (i32, i32) {
    %c0_i32 = arith.constant 0 : i32
    %c0_i32_0 = arith.constant 0 : i32
    %c0_i32_1 = arith.constant 0 : i32
    return %c0_i32, %c0_i32_0 : i32, i32
  }
  func.func @transform_3(%arg0: i32) -> (i32, i32) {
    %c0_i32 = arith.constant 0 : i32
    %c0_i32_0 = arith.constant 0 : i32
    %c0_i32_1 = arith.constant 0 : i32
    return %c0_i32, %c0_i32_0 : i32, i32
  }
  func.func @transform_4(%arg0: i32) -> (i32, i32) {
    %c0_i32 = arith.constant 0 : i32
    %c0_i32_0 = arith.constant 0 : i32
    %c0_i32_1 = arith.constant 0 : i32
    return %c0_i32, %c0_i32_0 : i32, i32
  }
  func.func @transform_5(%arg0: i32) -> (i32, i32) {
    %c0_i32 = arith.constant 0 : i32
    %c0_i32_0 = arith.constant 0 : i32
    %c0_i32_1 = arith.constant 0 : i32
    return %c0_i32, %c0_i32_0 : i32, i32
  }
  func.func @transform_6(%arg0: i32) -> (i32, i32) {
    %c0_i32 = arith.constant 0 : i32
    %c0_i32_0 = arith.constant 0 : i32
    %c0_i32_1 = arith.constant 0 : i32
    return %c0_i32, %c0_i32_0 : i32, i32
  }
  func.func @transform_7(%arg0: i32) -> (i32, i32) {
    %c0_i32 = arith.constant 0 : i32
    %c0_i32_0 = arith.constant 0 : i32
    return %c0_i32, %arg0 : i32, i32
  }
}

</mosaic_0001>

<bundles_post_ra>
// kernel: _lambda_.1
= control target key start
LH: loop header
LB: loop body
LE: loop exit
PB: predicated region body
PF: predicated region fallthrough
CT: control target
= control target key end

     0   :  { %12 = vsyncpa [#allocation3], 0  ;;  %s1070_s0 = inlined_call_operand.vmem [shape: bf16[32,128], index: 0, kind: input, shape index: {}]   ;;  %s1071_s1 = inlined_call_operand.hbm [shape: bf16[64,32], index: 1, kind: input, shape index: {}]   ;;  %s1072_s2 = inlined_call_operand.hbm [shape: bf16[64,1], index: 2, kind: input, shape index: {}]   ;;  %s1073_s3 = inlined_call_operand.vmem [shape: bf16[64,64], index: 3, kind: input, shape index: {}]   ;;  %s1074_s4 = inlined_call_operand.vmem [shape: bf16[64,1], index: 4, kind: input, shape index: {}]   ;;  %s1075_s5 = inlined_call_operand.vmem [shape: bf16[16,64], index: 5, kind: input, shape index: {}]   ;;  %s1076_s6 = inlined_call_operand.hbm [shape: f32[16,1], index: 6, kind: input, shape index: {}]   ;;  %s1077_s7 = inlined_call_operand.hbm [shape: f32[1,128], index: 7, kind: output, shape index: {}]  }
   0x1   :  { %13 = vsyncpa [#allocation6], 0 }
   0x2   :  { %14 = vsyncpa [#allocation4], 0  ;;  %s881_s24 = smov [#allocation5]   ;;  %s882_s26 = smov [#allocation2]  }
   0x3   :  { %s34_s25 = sshll.u32 %s881_s24, 4  ;;  %s22_s27 = sshll.u32 %s882_s26, 4  ;;  %s35_s25 = int_to_ptr.vmem [resolvable:$true] %s34_s25  ;;  %s933_s27 = int_to_ptr.vmem [resolvable:$true] %s22_s27 }
   0x4   :  { %s787_s30 = scalar_lea.hbm %s1072_s2, 512 }
   0x5   :  { %p788_p0 = scmp.ne.s32.totalorder %s1072_s2, %s787_s30  ;;  %p791_p1 = scmp.lt.u32.totalorder %s787_s30, %s1072_s2 }
   0x7   :  { %p793_p2 = pnand %p791_p1, %p788_p0 }
   0x9   :  { %796 = shalt.err (!%p793_p2)
}
   0xa   :  { %s797_s12 = scalar_lea.vmem %s35_s25, 512  ;;  %p802_p4 = scmp.lt.s32.totalorder %s35_s25, %s35_s25 }
   0xb   :  { %p798_p3 = scmp.ne.s32.totalorder %s35_s25, %s797_s12  ;;  %p803_p5 = scmp.lt.s32.totalorder %s797_s12, %s797_s12 }
   0xd   :  { %p804_p6 = por %p803_p5, %p802_p4 }
   0xf   :  { %p805_p7 = pnand %p804_p6, %p798_p3 }
  0x11   :  { %808 = shalt.err (!%p805_p7)
}
  0x12   :  { %s883_s13 = smov 64   ;;  %s884_s14 = smov 4  }
  0x13   :  { %40 = dma.hbm_to_vmem [thread:$0]  %s1072_s2, 512, %s35_s25, [#allocation6], %s883_s13, %s883_s13, %s884_s14  }
  0x14   :  { %s809_s19 = scalar_lea.hbm %s1071_s1, 512 }
  0x15   :  { %p810_p8 = scmp.ne.s32.totalorder %s1071_s1, %s809_s19  ;;  %p813_p9 = scmp.lt.u32.totalorder %s809_s19, %s1071_s1 }
  0x17   :  { %p815_p10 = pnand %p813_p9, %p810_p8 }
  0x19   :  { %818 = shalt.err (!%p815_p10)
}
  0x1a   :  { %s819_s24 = scalar_lea.vmem %s933_s27, 512  ;;  %p824_p12 = scmp.lt.s32.totalorder %s933_s27, %s933_s27 }
  0x1b   :  { %p820_p11 = scmp.ne.s32.totalorder %s933_s27, %s819_s24  ;;  %p825_p13 = scmp.lt.s32.totalorder %s819_s24, %s819_s24 }
  0x1d   :  { %p826_p0 = por %p825_p13, %p824_p12 }
  0x1f   :  { %p827_p1 = pnand %p826_p0, %p820_p11 }
  0x21   :  { %830 = shalt.err (!%p827_p1)
}
  0x22   :  { %28 = dma.hbm_to_vmem [thread:$0]  %s1071_s1, 512, %s933_s27, [#allocation3], %s883_s13, %s883_s13, %s884_s14  }
  0x23   :  { %s885_s26 = smov [#allocation7]   ;;  %s831_s8 = scalar_lea.hbm %s1076_s6, 256 }
  0x24   :  { %s52_s28 = sshll.u32 %s885_s26, 4  ;;  %p832_p2 = scmp.ne.s32.totalorder %s1076_s6, %s831_s8  ;;  %s53_s28 = int_to_ptr.vmem [resolvable:$true] %s52_s28 }
  0x25   :  { %p835_p3 = scmp.lt.u32.totalorder %s831_s8, %s1076_s6 }
  0x27   :  { %p837_p4 = pnand %p835_p3, %p832_p2 }
  0x29   :  { %840 = shalt.err (!%p837_p4)
}
  0x2a   :  { %s841_s15 = scalar_lea.vmem %s53_s28, 256  ;;  %p846_p6 = scmp.lt.s32.totalorder %s53_s28, %s53_s28 }
  0x2b   :  { %p842_p5 = scmp.ne.s32.totalorder %s53_s28, %s841_s15  ;;  %p847_p7 = scmp.lt.s32.totalorder %s841_s15, %s841_s15 }
  0x2d   :  { %p848_p8 = por %p847_p7, %p846_p6 }
  0x2f   :  { %p849_p9 = pnand %p848_p8, %p842_p5 }
  0x31   :  { %852 = shalt.err (!%p849_p9)
}
  0x32   :  { %s886_s1 = smov 128   ;;  %s887_s27 = smov 8  }
  0x33   :  { %58 = dma.hbm_to_vmem [thread:$0]  %s1076_s6, 256, %s53_s28, [#allocation6], %s886_s1, %s886_s1, %s887_s27  }
  0x34   :  { %875 = dma.done.wait [#allocation3], 512  }
  0x35   :  { %876 = vsyncadd [#allocation3], 4294966784 }
  0x36   :  { %877 = dma.done.wait [#allocation6], 768  }
  0x37   :  { %878 = vsyncadd [#allocation6], 4294966528  ;;  %v888_v0 = vmov 0   ;;  %v774_v1 = vld [vmem:[%s1070_s0] sm:$0xff]   ;;  %v775_v2 = vld [vmem:[%s1070_s0 + $0x8] sm:$0xff]   ;;  %vm113_vm0 = vcmask 261120   ;;  %v211_v28 = vlaneseq }
  0x38   :  { %772 = vset.pattern.permute.xlu0 %v888_v0  ;;  %773 = vset.pattern.permute.xlu1 %v888_v0  ;;  %v776_v3 = vld [vmem:[#allocation2] sm:$0xff]   ;;  %v777_v4 = vld [vmem:[#allocation2 + $0x8] sm:$0xff]   ;;  %v778_v7 = vld [vmem:[#allocation2 + $0x10] sm:$0xff]   ;;  %vm359_vm1 = vcmask 523264   ;;  %v889_v26 = vmov 839922192  }
  0x39   :  { %720 = vmatprep.subr.bf16.mxu0 %v774_v1  ;;  %724 = vmatprep.mubr.msk.bf16.mxu0 %vm113_vm0, %v776_v3  ;;  %v195_v5 = vld [vmem:[#allocation5] sm:$0xf]  ;;  %v197_v6 = vld [vmem:[#allocation5 + $0x8] sm:$0xf]  ;;  %v196_v8 = vld [vmem:[#allocation5 + $0x4] sm:$0xf]  ;;  %v209_v27 = vunpack.c.l.s4 %v889_v26 }
  0x3a   :  { %721 = vmatpush3.bf16.msra.mxu0 %v774_v1  ;;  %205 = vperm.xlu0 %772, %v195_v5   ;;  %v198_v9 = vld [vmem:[#allocation5 + $0xc] sm:$0xf]  ;;  %v199_v10 = vld [vmem:[#allocation5 + $0x10] sm:$0xf]  ;;  %v200_v11 = vld [vmem:[#allocation5 + $0x14] sm:$0xf] }
  0x3b   :  { %722 = vmatprep.subr.bf16.mxu0 %v775_v2  ;;  %229 = vperm.xlu1 %773, %v197_v6   ;;  %v779_v12 = vld [vmem:[#allocation2 + $0x18] sm:$0xff]   ;;  %v441_v15 = vld [vmem:[%s1074_s4] sm:$0xf]  ;;  %v442_v16 = vld [vmem:[%s1074_s4 + $0x4] sm:$0xf]  ;;  %v210_v31 = vunpack.c.0.s8 %v209_v27  ;;  %v212_v32 = vshrl.u32 %v211_v28, 7 }
  0x3c   :  { %v201_v13 = vld [vmem:[#allocation5 + $0x18] sm:$0xf]  ;;  %v202_v14 = vld [vmem:[#allocation5 + $0x1c] sm:$0xf]  ;;  %v443_v17 = vld [vmem:[%s1074_s4 + $0x8] sm:$0xf] }
  0x3d   :  { %v444_v18 = vld [vmem:[%s1074_s4 + $0xc] sm:$0xf]  ;;  %v445_v19 = vld [vmem:[%s1074_s4 + $0x10] sm:$0xf]  ;;  %v446_v20 = vld [vmem:[%s1074_s4 + $0x14] sm:$0xf]  ;;  %v1016_v35 = vsub.s32 %v210_v31, %v212_v32 }
  0x3e   :  { %723 = vmatpush3.bf16.msra.mxu0 %v775_v2  ;;  %217 = vperm.xlu0 %772, %v196_v8   ;;  %v447_v21 = vld [vmem:[%s1074_s4 + $0x18] sm:$0xf]  ;;  %v448_v22 = vld [vmem:[%s1074_s4 + $0x1c] sm:$0xf]  ;;  %v579_v23 = vld [vmem:[#allocation7] sm:$0xff]  ;;  %vm891_vm2 = vmmov 0  }
  0x3f   :  { %241 = vperm.xlu1 %773, %v198_v9   ;;  %v580_v24 = vld [vmem:[#allocation7 + $0x8] sm:$0xff]  ;;  %v780_v25 = vld [vmem:[%s1073_s3] sm:$0xff]  }
  0x40   :  { %740 = vmatprep.mubr.msk.bf16.mxu1 %vm359_vm1, %v780_v25  ;;  %v781_v9 = vld [vmem:[%s1073_s3 + $0x8] sm:$0xff]  }
  0x41   :  { %725 = vmatmul.mubr.msk.bf16.vlgmr.msra.gmra.mrb[0].mxu0 %vm113_vm0, %v777_v4 }
  0x42   :  { %728 = vmatprep.mubr.msk.bf16.mxu0 %vm113_vm0, %v778_v7  ;;  %253 = vperm.xlu0 %772, %v199_v10   ;;  %v782_v10 = vld [vmem:[%s1073_s3 + $0x10] sm:$0xff]  }
  0x43   :  { %265 = vperm.xlu1 %773, %v200_v11   ;;  %v783_v11 = vld [vmem:[%s1073_s3 + $0x18] sm:$0xff]  }
  0x46   :  { %277 = vperm.xlu0 %772, %v201_v13  }
  0x47   :  { %289 = vperm.xlu1 %773, %v202_v14  }
  0x49   :  { %729 = vmatmul.mubr.msk.bf16.gmra.mrb[4].mxu0 %vm113_vm0, %v779_v12  ;;  %v890_v12 = vmov 0.0  }
  0x4a   :  { %451 = vperm.xlu0 %772, %v441_v15   ;;  %748 = vmatprep.subr.bf16.mxu0 %v890_v12 }
  0x4b   :  { %463 = vperm.xlu1 %773, %v442_v16   ;;  %756 = vmatprep.mubr.msk.bf16.mxu0 %vm891_vm2, %v890_v12 }
  0x4e   :  { %475 = vperm.xlu0 %772, %v443_v17  }
  0x4f   :  { %487 = vperm.xlu1 %773, %v444_v18  }
  0x52   :  { %499 = vperm.xlu0 %772, %v445_v19  }
  0x53   :  { %511 = vperm.xlu1 %773, %v446_v20  }
  0x56   :  { %523 = vperm.xlu0 %772, %v447_v21  }
  0x57   :  { %535 = vperm.xlu1 %773, %v448_v22  }
  0x5a   :  { %583 = vperm.xlu0 %772, %v579_v23  }
  0x5b   :  { %588 = vperm.xlu1 %773, %v580_v24  }
  0xb9   :  { %v206_v29 = vpop.permute.xlu0 %205 }
  0xba   :  { %v230_v30 = vpop.permute.xlu1 %229  ;;  %v214_v38 = vrot.slane %v206_v29, %v1016_v35 }
  0xbb   :  { %v238_v36 = vrot.slane %v230_v30, %v1016_v35 }
  0xbd   :  { %v218_v33 = vpop.permute.xlu0 %217 }
  0xbe   :  { %v242_v34 = vpop.permute.xlu1 %241  ;;  %v226_v39 = vrot.slane %v218_v33, %v1016_v35 }
  0xbf   :  { %v250_v37 = vrot.slane %v242_v34, %v1016_v35 }
  0xc0   :  { %v683_v48 = vcombine.low %v214_v38, %v226_v39 }
  0xc1   :  { %v254_v40 = vpop.permute.xlu0 %253  ;;  %v684_v44 = vcombine.low %v238_v36, %v250_v37 }
  0xc2   :  { %v266_v42 = vpop.permute.xlu1 %265  ;;  %v262_v52 = vrot.slane %v254_v40, %v1016_v35 }
  0xc3   :  { %v274_v55 = vrot.slane %v266_v42, %v1016_v35 }
  0xc5   :  { %v278_v53 = vpop.permute.xlu0 %277  ;;  %v685_v2 = vcombine.low %v262_v52, %v274_v55 }
  0xc6   :  { %v290_v54 = vpop.permute.xlu1 %289  ;;  %v286_v56 = vrot.slane %v278_v53, %v1016_v35  ;;  %v784_v53 = vld [vmem:[%s1075_s5] sm:$0xff]   ;;  %s892_s5 = smov [#allocation8]  }
  0xc7   :  { %v298_v57 = vrot.slane %v290_v54, %v1016_v35  ;;  %s663_s17 = sshll.u32 %s892_s5, 4  ;;  %s664_s17 = int_to_ptr.vmem [resolvable:$true] %s663_s17 }
  0xc8   :  { %s853_s18 = scalar_lea.vmem %s664_s17, 16  ;;  %s857_s19 = scalar_lea.vmem %s664_s17, 32 }
  0xc9   :  { %v686_v3 = vcombine.low %v286_v56, %v298_v57  ;;  %v452_v14 = vpop.permute.xlu0 %451  ;;  %p854_p10 = scmp.ne.s32.totalorder %s664_s17, %s853_s18  ;;  %p858_p11 = scmp.lt.s32.totalorder %s664_s17, %s664_s17 }
  0xca   :  { %v464_v13 = vpop.permute.xlu1 %463  ;;  %v460_v20 = vrot.slane %v452_v14, %v1016_v35  ;;  %p859_p12 = scmp.lt.s32.totalorder %s857_s19, %s853_s18 }
  0xcb   :  { %v472_v21 = vrot.slane %v464_v13, %v1016_v35 }
  0xcc   :  { %p860_p13 = por %p859_p12, %p858_p11 }
  0xcd   :  { %v476_v16 = vpop.permute.xlu0 %475  ;;  %v695_v29 = vcombine.low %v460_v20, %v472_v21 }
  0xce   :  { %v488_v15 = vpop.permute.xlu1 %487  ;;  %v484_v18 = vrot.slane %v476_v16, %v1016_v35  ;;  %p861_p0 = pnand %p860_p13, %p854_p10 }
  0xcf   :  { %v496_v19 = vrot.slane %v488_v15, %v1016_v35 }
  0xd1   :  { %v500_v22 = vpop.permute.xlu0 %499  ;;  %v696_v26 = vcombine.low %v484_v18, %v496_v19 }
  0xd2   :  { %v512_v17 = vpop.permute.xlu1 %511  ;;  %v508_v38 = vrot.slane %v500_v22, %v1016_v35 }
  0xd3   :  { %v520_v39 = vrot.slane %v512_v17, %v1016_v35 }
  0xd5   :  { %v524_v33 = vpop.permute.xlu0 %523 }
  0xd6   :  { %v536_v30 = vpop.permute.xlu1 %535  ;;  %v532_v36 = vrot.slane %v524_v33, %v1016_v35 }
  0xd7   :  { %v544_v37 = vrot.slane %v536_v30, %v1016_v35 }
  0xd9   :  { %v584_v54 = vpop.permute.xlu0 %583 }
 0x114   :  { %v726_v41 = vpop.f32.mrb[0].mxu0 }
 0x115   :  { %v160_v43 = vpop.f32.mrb[1].mxu0 }
 0x116   :  { %v727_v45 = vpop.f32.mrb[2].mxu0 }
 0x117   :  { %v192_v46 = vpack.c.bf16 %v727_v45, %v726_v41  ;;  %v163_v47 = vpop.f32.mrb[3].mxu0 }
 0x118   :  { %v191_v49 = vpack.c.bf16 %v163_v47, %v160_v43  ;;  %v697_v47 = vcombine.low %v508_v38, %v520_v39 }
 0x119   :  { %v324_v50 = vadd.bf16 %v684_v44, %v192_v46  ;;  %v698_v44 = vcombine.low %v532_v36, %v544_v37 }
 0x11a   :  { %v323_v51 = vadd.bf16 %v683_v48, %v191_v49 }
 0x11b   :  { %v328_v62 = vmax.bf16 %v888_v0, %v324_v50 }
 0x11c   :  { %v730_v58 = vpop.f32.mrb[4].mxu0  ;;  %v327_v59 = vmax.bf16 %v888_v0, %v323_v51 }
 0x11d   :  { %v176_v60 = vpop.f32.mrb[5].mxu0 }
 0x11e   :  { %v731_v61 = vpop.f32.mrb[6].mxu0  ;;  %732 = vmatprep.subr.bf16.mxu1 %v327_v59 }
 0x11f   :  { %v194_v63 = vpack.c.bf16 %v731_v61, %v730_v58  ;;  %v179_v1 = vpop.f32.mrb[7].mxu0  ;;  %733 = vmatpush3.bf16.msra.mxu1 %v327_v59  ;;  %v589_v58 = vpop.permute.xlu1 %588 }
 0x120   :  { %v193_v4 = vpack.c.bf16 %v179_v1, %v176_v60  ;;  %734 = vmatprep.subr.bf16.mxu1 %v328_v62 }
 0x121   :  { %v326_v5 = vadd.bf16 %v686_v3, %v194_v63 }
 0x122   :  { %v325_v6 = vadd.bf16 %v685_v2, %v193_v4 }
 0x123   :  { %735 = vmatpush3.bf16.msra.mxu1 %v328_v62  ;;  %v330_v8 = vmax.bf16 %v888_v0, %v326_v5 }
 0x124   :  { %v329_v7 = vmax.bf16 %v888_v0, %v325_v6 }
 0x126   :  { %736 = vmatprep.subr.bf16.mxu1 %v329_v7 }
 0x127   :  { %737 = vmatpush3.bf16.msra.mxu1 %v329_v7 }
 0x128   :  { %738 = vmatprep.subr.bf16.mxu1 %v330_v8 }
 0x12b   :  { %739 = vmatpush3.bf16.msra.mxu1 %v330_v8 }
 0x12e   :  { %741 = vmatmul.mubr.msk.bf16.vlgmr.msra.gmra.mrb[0].mxu1 %vm359_vm1, %v781_v9 }
 0x12f   :  { %744 = vmatprep.mubr.msk.bf16.mxu1 %vm359_vm1, %v782_v10 }
 0x136   :  { %745 = vmatmul.mubr.msk.bf16.gmra.mrb[4].mxu1 %vm359_vm1, %v783_v11 }
 0x201   :  { %v742_v23 = vpop.f32.mrb[0].mxu1 }
 0x202   :  { %v406_v24 = vpop.f32.mrb[1].mxu1 }
 0x203   :  { %v743_v25 = vpop.f32.mrb[2].mxu1 }
 0x204   :  { %v438_v27 = vpack.c.bf16 %v743_v25, %v742_v23  ;;  %v409_v28 = vpop.f32.mrb[3].mxu1 }
 0x205   :  { %v437_v31 = vpack.c.bf16 %v409_v28, %v406_v24 }
 0x206   :  { %v570_v32 = vadd.bf16 %v696_v26, %v438_v27 }
 0x207   :  { %v569_v34 = vadd.bf16 %v695_v29, %v437_v31 }
 0x208   :  { %v574_v48 = vmax.bf16 %v888_v0, %v570_v32 }
 0x209   :  { %v573_v40 = vmax.bf16 %v888_v0, %v569_v34  ;;  %v746_v41 = vpop.f32.mrb[4].mxu1 }
 0x20a   :  { %v422_v42 = vpop.f32.mrb[5].mxu1 }
 0x20b   :  { %v747_v43 = vpop.f32.mrb[6].mxu1  ;;  %749 = vmatpush3.bf16.msra.mxu0 %v573_v40 }
 0x20c   :  { %v440_v45 = vpack.c.bf16 %v747_v43, %v746_v41  ;;  %v425_v46 = vpop.f32.mrb[7].mxu1  ;;  %750 = vmatprep.subr.bf16.mxu0 %v890_v12 }
 0x20d   :  { %v439_v49 = vpack.c.bf16 %v425_v46, %v422_v42 }
 0x20e   :  { %v572_v50 = vadd.bf16 %v698_v44, %v440_v45 }
 0x20f   :  { %v571_v51 = vadd.bf16 %v697_v47, %v439_v49  ;;  %751 = vmatpush3.bf16.msra.mxu0 %v574_v48 }
 0x210   :  { %752 = vmatprep.subr.bf16.mxu0 %v890_v12  ;;  %v576_v52 = vmax.bf16 %v888_v0, %v572_v50 }
 0x211   :  { %v575_v35 = vmax.bf16 %v888_v0, %v571_v51 }
 0x213   :  { %753 = vmatpush3.bf16.msra.mxu0 %v575_v35 }
 0x214   :  { %754 = vmatprep.subr.bf16.mxu0 %v890_v12 }
 0x217   :  { %755 = vmatpush3.bf16.msra.mxu0 %v576_v52 }
 0x21a   :  { %757 = vmatmul.mubr.msk.bf16.vlgmr.msra.gmra.mrb[8].mxu0 %vm359_vm1, %v784_v53 }
 0x2ed   :  { %v633_v55 = vpop.f32.mrb[8].mxu0 }
 0x2ee   :  { %v634_v56 = vadd.f32 %v633_v55, %v584_v54  ;;  %v758_v57 = vpop.f32.mrb[9].mxu0 }
 0x2ef   :  { %v636_v59 = vpop.f32.mrb[10].mxu0 }
 0x2f0   :  { %v637_v60 = vadd.f32 %v636_v59, %v589_v58  ;;  %v759_v61 = vpop.f32.mrb[11].mxu0  ;;  %v640_v62 = vmul.f32 %v634_v56, %v634_v56 }
 0x2f2   :  { %v641_v63 = vmul.f32 %v637_v60, %v637_v60 }
 0x2f4   :  { %v642_v1 = vadd.f32 %v641_v63, %v640_v62 }
 0x2f6   :  { %v643_v2 = vrot.slane %v642_v1, 4 }
 0x2f8   :  { %v644_v0 = vadd.f32 %v643_v2, %v642_v1 }
 0x2fa   :  { %v645_v3 = vrot.slane %v644_v0, 2 }
 0x2fc   :  { %v646_v4 = vadd.f32 %v645_v3, %v644_v0 }
 0x2fe   :  { %v647_v5 = vrot.slane %v646_v4, 1 }
 0x300   :  { %v648_v6 = vadd.f32 %v647_v5, %v646_v4 }
 0x302   :  { %785 = vrsqrt.f32 %v648_v6  ;;  %vm651_vm3 = vcmp.eq.f32.partialorder %v648_v6, inf  ;;  %v654_v9 = vand.u32 2147483648, %v648_v6  ;;  %vm653_vm4 = vcmp.eq.f32.partialorder %v648_v6, 0.0 }
 0x30c   :  { %v786_v7 = vpop.eup %785 }
 0x30d   :  { %v650_v8 = vmul.f32 %v786_v7, %v648_v6 }
 0x30f   :  { %v652_v10 = vsel %vm651_vm3, %v648_v6, %v650_v8 }
 0x310   :  { %v655_v11 = vsel %vm653_vm4, %v654_v9, %v652_v10 }
 0x311   :  { %656 = vst [vmem:[#allocation8] sm:$0x1] %v655_v11 }
 0x312   :  { %864 = shalt.err (!%p861_p0)
}
 0x313   :  { %s865_s20 = scalar_lea.hbm %s1077_s7, 16 }
 0x314   :  { %p866_p1 = scmp.ne.s32.totalorder %s1077_s7, %s865_s20  ;;  %p869_p2 = scmp.lt.u32.totalorder %s865_s20, %s1077_s7 }
 0x316   :  { %p871_p3 = pnand %p869_p2, %p866_p1 }
 0x318   :  { %874 = shalt.err (!%p871_p3)
}
 0x319   :  { %666 = dma.vmem_to_hbm [thread:$0]  %s664_s17, 16, %s1077_s7, [#allocation4]  }
 0x31a   :  { %879 = dma.done.wait [#allocation4], 16  }
 0x31b   :  { %880 = vsyncadd [#allocation4], 4294967280 }
 0x31c   :  { %670 = vsyncpa [#allocation3], 1 }
 0x31d   :  { %671 = vsyncpa [#allocation6], 1 }
 0x31e   :  { %672 = vsyncpa [#allocation4], 1 }

</bundles_post_ra>
